<compile_context>
chip_gen: v5e
topology: v5e:2x2
jax: 0.10.0
libtpu: 0.0.40
codegen_flags: <defaults>
</compile_context>

<pallas_src>
import functools

import jax
import jax.numpy as jnp
from jax.experimental import pallas as pl
from jax.experimental.pallas import tpu as pltpu

HIDDEN_LAYER_SIZE = 100
INPUT_SIZE = 4
OUTPUT_SIZE = 3

HIDDEN_PAD = 128  # lane-dense packed tile width (hidden lanes 0..99, output lanes 100..102)


def _round_up(n, m):
    return ((n + m - 1) // m) * m


def pad_params(w1, b1, w2, b2):
    """Pad parameters once (outside jit).  w1:[4,100] b1:[100] w2:[100,3] b2:[3].

    w2/b2's real output columns are placed at lanes HIDDEN..HIDDEN+2 so the kernel
    can pack hidden+output into a single 128-wide tile with a plain add."""
    w1p = jnp.zeros((INPUT_SIZE, HIDDEN_PAD), w1.dtype).at[:, :HIDDEN_LAYER_SIZE].set(w1)
    b1p = jnp.zeros((1, HIDDEN_PAD), b1.dtype).at[0, :HIDDEN_LAYER_SIZE].set(b1)
    lo, hi = HIDDEN_LAYER_SIZE, HIDDEN_LAYER_SIZE + OUTPUT_SIZE
    w2p = jnp.zeros((HIDDEN_PAD, HIDDEN_PAD), w2.dtype).at[:HIDDEN_LAYER_SIZE, lo:hi].set(w2)
    b2p = jnp.zeros((1, HIDDEN_PAD), b2.dtype).at[0, lo:hi].set(b2)
    return w1p, b1p, w2p, b2p


def _mlp_kernel(x_ref, w1_ref, b1_ref, w2_ref, b2_ref, packed_ref):
    x = x_ref[...]  # [tb, 4] f32
    # fc1 as 4 VPU broadcast multiply-adds (K=4 is far too small for the MXU and
    # this lets us feed x unpadded).  Lanes 100..127 of h stay exactly 0 because
    # w1p/b1p are zero there.
    h = b1_ref[...] + x[:, 0:1] * w1_ref[0:1, :]
    for k in range(1, INPUT_SIZE):
        h = h + x[:, k:k + 1] * w1_ref[k:k + 1, :]
    h = jnp.maximum(h, 0.0)  # [tb, 128]; hidden at lanes 0..99, zeros elsewhere
    # fc2 on the MXU: w2p is nonzero only in columns 100..102, so o is the real
    # output at lanes 100..102 and zero everywhere else.
    o = jnp.dot(h, w2_ref[...], preferred_element_type=jnp.float32)
    # Pack hidden (lanes 0..99) + output (lanes 100..102) into one lane-dense tile.
    packed_ref[...] = (h + o + b2_ref[...]).astype(packed_ref.dtype)


@functools.partial(jax.jit, static_argnames=("block_batch", "store_dtype"))
def simple_nn_forward(x, w1p, b1p, w2p, b2p, *, block_batch=2048,
                      store_dtype=jnp.float32):
    """x: [B, 4] f32; padded params from pad_params().

    Returns (output [B, 3], hidden [B, 100]) — same forward as the nn.Module."""
    batch = x.shape[0]

    # Balanced batch tiling; keep >=2 grid steps (when batch allows) so the
    # "parallel" axis gives both v7x TensorCores work.
    num_tiles = pl.cdiv(batch, block_batch)
    if num_tiles < 2 and batch >= 16:
        num_tiles = 2
    tb = _round_up(pl.cdiv(batch, num_tiles), 8)
    grid = (pl.cdiv(batch, tb),)  # partial last block handled by Pallas masking

    store_bytes = jnp.dtype(store_dtype).itemsize
    cost = pl.CostEstimate(
        flops=2 * batch * (INPUT_SIZE * HIDDEN_PAD + HIDDEN_PAD * HIDDEN_PAD),
        transcendentals=0,
        bytes_accessed=(batch * INPUT_SIZE * x.dtype.itemsize          # x read
                        + batch * HIDDEN_PAD * store_bytes             # packed write
                        + 4 * (w1p.size + b1p.size + w2p.size + b2p.size)),
    )

    packed = pl.pallas_call(
        _mlp_kernel,
        out_shape=jax.ShapeDtypeStruct((batch, HIDDEN_PAD), store_dtype),
        grid=grid,
        in_specs=[
            pl.BlockSpec((tb, INPUT_SIZE), lambda i: (i, 0)),        # x tile (unpadded cols)
            pl.BlockSpec((INPUT_SIZE, HIDDEN_PAD), lambda i: (0, 0)),  # w1 (resident)
            pl.BlockSpec((1, HIDDEN_PAD), lambda i: (0, 0)),           # b1 (resident)
            pl.BlockSpec((HIDDEN_PAD, HIDDEN_PAD), lambda i: (0, 0)),  # w2 (resident)
            pl.BlockSpec((1, HIDDEN_PAD), lambda i: (0, 0)),           # b2 (resident)
        ],
        out_specs=pl.BlockSpec((tb, HIDDEN_PAD), lambda i: (i, 0)),    # single packed store
        compiler_params=pltpu.CompilerParams(
            dimension_semantics=("parallel",),   # megacore-shard batch tiles on v7x
        ),
        cost_estimate=cost,
    )(x, w1p, b1p, w2p, b2p)

    # Callers that can consume the packed (B, 128) layout should take `packed`
    # directly to avoid these two slice copies.
    hidden = packed[:, :HIDDEN_LAYER_SIZE]
    output = packed[:, HIDDEN_LAYER_SIZE:HIDDEN_LAYER_SIZE + OUTPUT_SIZE]
    return output, hidden


def _init_params(key):
    """Deterministic init mimicking nn.Linear's uniform(-1/sqrt(fan_in), +)."""
    k1, k2, k3, k4 = jax.random.split(key, 4)
    bound1 = 1.0 / jnp.sqrt(INPUT_SIZE)
    bound2 = 1.0 / jnp.sqrt(HIDDEN_LAYER_SIZE)
    # Stored as [in, out] (transpose of PyTorch's [out, in]) so kernel does x @ W.
    w1 = jax.random.uniform(k1, (INPUT_SIZE, HIDDEN_LAYER_SIZE),
                            jnp.float32, -bound1, bound1)
    b1 = jax.random.uniform(k2, (HIDDEN_LAYER_SIZE,), jnp.float32, -bound1, bound1)
    w2 = jax.random.uniform(k3, (HIDDEN_LAYER_SIZE, OUTPUT_SIZE),
                            jnp.float32, -bound2, bound2)
    b2 = jax.random.uniform(k4, (OUTPUT_SIZE,), jnp.float32, -bound2, bound2)
    return w1, b1, w2, b2


if __name__ == "__main__":
    key = jax.random.PRNGKey(0)
    k_params, k_x = jax.random.split(key)

    w1, b1, w2, b2 = _init_params(k_params)
    padded_params = pad_params(w1, b1, w2, b2)   # hoisted: pad once, reuse per call

    # batch=8: single tile.  batch=40: two tiles + a partial last block (masked),
    # exercising the multi-TensorCore / non-dividing-grid path.
    for batch in (8, 40):
        kx = jax.random.fold_in(k_x, batch)
        x = jax.random.normal(kx, (batch, INPUT_SIZE), jnp.float32)

        output, hidden = simple_nn_forward(x, *padded_params)
        jax.block_until_ready((output, hidden))

        # Reference in plain JAX (same math as the PyTorch forward), exact precision.
        hidden_ref = jnp.maximum(jnp.dot(x, w1, precision="highest") + b1, 0.0)
        output_ref = jnp.dot(hidden_ref, w2, precision="highest") + b2

        assert output.shape == (batch, OUTPUT_SIZE)
        assert hidden.shape == (batch, HIDDEN_LAYER_SIZE)
        # Tolerance covers the MXU's default-precision f32 fc2 matmul and would
        # also cover an optional store_dtype=jnp.bfloat16 run.
        assert jnp.allclose(hidden, hidden_ref, atol=1e-2, rtol=1e-2)
        assert jnp.allclose(output, output_ref, atol=1e-2, rtol=1e-2)

    print("KERNEL_OK")
</pallas_src>

<mosaic_0001>
module attributes {stable_mosaic.version = 11 : i64} {
  func.func @_mlp_kernel(%arg0: i32, %arg1: memref<8x4xf32, #tpu.memory_space<vmem>>, %arg2: memref<4x128xf32, #tpu.memory_space<vmem>>, %arg3: memref<1x128xf32, #tpu.memory_space<vmem>>, %arg4: memref<128x128xf32, #tpu.memory_space<vmem>>, %arg5: memref<1x128xf32, #tpu.memory_space<vmem>>, %arg6: memref<8x128xf32, #tpu.memory_space<vmem>>) attributes {dimension_semantics = [#tpu.dimension_semantics<parallel>], iteration_bounds = array<i64: 1>, scalar_prefetch = 0 : i64, scratch_operands = 0 : i64, tpu.core_type = #tpu.core_type<tc>, window_params = [{transform_indices = @transform_0, window_bounds = array<i64: 8, 4>}, {pipeline_mode = #tpu.pipeline_mode<synchronous>, transform_indices = @transform_1, window_bounds = array<i64: 4, 128>}, {pipeline_mode = #tpu.pipeline_mode<synchronous>, transform_indices = @transform_2, window_bounds = array<i64: 1, 128>}, {pipeline_mode = #tpu.pipeline_mode<synchronous>, transform_indices = @transform_3, window_bounds = array<i64: 128, 128>}, {pipeline_mode = #tpu.pipeline_mode<synchronous>, transform_indices = @transform_4, window_bounds = array<i64: 1, 128>}, {transform_indices = @transform_5, window_bounds = array<i64: 8, 128>}]} {
    %c0 = arith.constant 0 : index
    %c0_0 = arith.constant 0 : index
    %0 = vector.load %arg1[%c0, %c0_0] : memref<8x4xf32, #tpu.memory_space<vmem>>, vector<8x4xf32>
    %c0_1 = arith.constant 0 : index
    %c0_2 = arith.constant 0 : index
    %1 = vector.load %arg3[%c0_1, %c0_2] : memref<1x128xf32, #tpu.memory_space<vmem>>, vector<1x128xf32>
    %2 = vector.extract_strided_slice %0 {offsets = [0, 0], sizes = [8, 1], strides = [1, 1]} : vector<8x4xf32> to vector<8x1xf32>
    %c0_3 = arith.constant 0 : index
    %c0_4 = arith.constant 0 : index
    %3 = vector.load %arg2[%c0_3, %c0_4] : memref<4x128xf32, #tpu.memory_space<vmem>>, vector<1x128xf32>
    %4 = vector.broadcast %2 : vector<8x1xf32> to vector<8x128xf32>
    %5 = vector.broadcast %3 : vector<1x128xf32> to vector<8x128xf32>
    %6 = arith.mulf %4, %5 : vector<8x128xf32>
    %7 = vector.broadcast %1 : vector<1x128xf32> to vector<8x128xf32>
    %8 = arith.addf %7, %6 : vector<8x128xf32>
    %9 = vector.extract_strided_slice %0 {offsets = [0, 1], sizes = [8, 1], strides = [1, 1]} : vector<8x4xf32> to vector<8x1xf32>
    %c1 = arith.constant 1 : index
    %c0_5 = arith.constant 0 : index
    %10 = vector.load %arg2[%c1, %c0_5] : memref<4x128xf32, #tpu.memory_space<vmem>>, vector<1x128xf32>
    %11 = vector.broadcast %9 : vector<8x1xf32> to vector<8x128xf32>
    %12 = vector.broadcast %10 : vector<1x128xf32> to vector<8x128xf32>
    %13 = arith.mulf %11, %12 : vector<8x128xf32>
    %14 = arith.addf %8, %13 : vector<8x128xf32>
    %15 = vector.extract_strided_slice %0 {offsets = [0, 2], sizes = [8, 1], strides = [1, 1]} : vector<8x4xf32> to vector<8x1xf32>
    %c2 = arith.constant 2 : index
    %c0_6 = arith.constant 0 : index
    %16 = vector.load %arg2[%c2, %c0_6] : memref<4x128xf32, #tpu.memory_space<vmem>>, vector<1x128xf32>
    %17 = vector.broadcast %15 : vector<8x1xf32> to vector<8x128xf32>
    %18 = vector.broadcast %16 : vector<1x128xf32> to vector<8x128xf32>
    %19 = arith.mulf %17, %18 : vector<8x128xf32>
    %20 = arith.addf %14, %19 : vector<8x128xf32>
    %21 = vector.extract_strided_slice %0 {offsets = [0, 3], sizes = [8, 1], strides = [1, 1]} : vector<8x4xf32> to vector<8x1xf32>
    %c3 = arith.constant 3 : index
    %c0_7 = arith.constant 0 : index
    %22 = vector.load %arg2[%c3, %c0_7] : memref<4x128xf32, #tpu.memory_space<vmem>>, vector<1x128xf32>
    %23 = vector.broadcast %21 : vector<8x1xf32> to vector<8x128xf32>
    %24 = vector.broadcast %22 : vector<1x128xf32> to vector<8x128xf32>
    %25 = arith.mulf %23, %24 : vector<8x128xf32>
    %26 = arith.addf %20, %25 : vector<8x128xf32>
    %cst = arith.constant 0.000000e+00 : f32
    %27 = vector.broadcast %cst : f32 to vector<8x128xf32>
    %28 = arith.maximumf %26, %27 : vector<8x128xf32>
    %c0_8 = arith.constant 0 : index
    %c0_9 = arith.constant 0 : index
    %29 = vector.load %arg4[%c0_8, %c0_9] : memref<128x128xf32, #tpu.memory_space<vmem>>, vector<128x128xf32>
    %cst_10 = arith.constant dense<0.000000e+00> : vector<8x128xf32>
    %30 = tpu.matmul %28, %29, %cst_10 {dimension_numbers = #tpu.dot_dimension_numbers<[1], [0], [0], [1], [0, 0, 1, 1], [], []>} : vector<8x128xf32>, vector<128x128xf32>, vector<8x128xf32> -> vector<8x128xf32>
    %31 = arith.addf %28, %30 : vector<8x128xf32>
    %c0_11 = arith.constant 0 : index
    %c0_12 = arith.constant 0 : index
    %32 = vector.load %arg5[%c0_11, %c0_12] : memref<1x128xf32, #tpu.memory_space<vmem>>, vector<1x128xf32>
    %33 = vector.broadcast %32 : vector<1x128xf32> to vector<8x128xf32>
    %34 = arith.addf %31, %33 : vector<8x128xf32>
    %c0_13 = arith.constant 0 : index
    %c0_14 = arith.constant 0 : index
    %35 = vector.load %arg6[%c0_13, %c0_14] : memref<8x128xf32, #tpu.memory_space<vmem>>, vector<8x128xf32>
    tpu.vector_store %arg6[%c0_13, %c0_14], %34 {strides = array<i32>} : memref<8x128xf32, #tpu.memory_space<vmem>>, vector<8x128xf32>,
    return
  }
  func.func @transform_0(%arg0: i32) -> (i32, i32) {
    %c0_i32 = arith.constant 0 : i32
    %c0_i32_0 = arith.constant 0 : i32
    return %arg0, %c0_i32 : i32, i32
  }
  func.func @transform_1(%arg0: i32) -> (i32, i32) {
    %c0_i32 = arith.constant 0 : i32
    %c0_i32_0 = arith.constant 0 : i32
    %c0_i32_1 = arith.constant 0 : i32
    return %c0_i32, %c0_i32_0 : i32, i32
  }
  func.func @transform_2(%arg0: i32) -> (i32, i32) {
    %c0_i32 = arith.constant 0 : i32
    %c0_i32_0 = arith.constant 0 : i32
    %c0_i32_1 = arith.constant 0 : i32
    return %c0_i32, %c0_i32_0 : i32, i32
  }
  func.func @transform_3(%arg0: i32) -> (i32, i32) {
    %c0_i32 = arith.constant 0 : i32
    %c0_i32_0 = arith.constant 0 : i32
    %c0_i32_1 = arith.constant 0 : i32
    return %c0_i32, %c0_i32_0 : i32, i32
  }
  func.func @transform_4(%arg0: i32) -> (i32, i32) {
    %c0_i32 = arith.constant 0 : i32
    %c0_i32_0 = arith.constant 0 : i32
    %c0_i32_1 = arith.constant 0 : i32
    return %c0_i32, %c0_i32_0 : i32, i32
  }
  func.func @transform_5(%arg0: i32) -> (i32, i32) {
    %c0_i32 = arith.constant 0 : i32
    %c0_i32_0 = arith.constant 0 : i32
    return %arg0, %c0_i32 : i32, i32
  }
}

</mosaic_0001>

<bundles_post_ra>
// kernel: simple_nn_forward.1
= control target key start
LH: loop header
LB: loop body
LE: loop exit
PB: predicated region body
PF: predicated region fallthrough
CT: control target
= control target key end

     0   :  { %10 = vsyncpa [#allocation3], 0  ;;  %s167_s21 = smov [#allocation2]   ;;  %s168_s23 = smov 128   ;;  %s231_s0 = inlined_call_operand.vmem [shape: f32[8,4], index: 0, kind: input, shape index: {}]   ;;  %s232_s1 = inlined_call_operand.vmem [shape: f32[4,128], index: 1, kind: input, shape index: {}]   ;;  %s233_s2 = inlined_call_operand.vmem [shape: f32[1,128], index: 2, kind: input, shape index: {}]   ;;  %s234_s3 = inlined_call_operand.hbm [shape: f32[128,128], index: 3, kind: input, shape index: {}]   ;;  %s235_s4 = inlined_call_operand.vmem [shape: f32[1,128], index: 4, kind: input, shape index: {}]   ;;  %s236_s5 = inlined_call_operand.vmem [shape: f32[8,128], index: 5, kind: output, shape index: {}]  }
   0x1   :  { %s21_s20 = sshll.u32 %s234_s3, 4  ;;  %s23_s22 = sshll.u32 %s167_s21, 4  ;;  %s22_s20 = int_to_ptr.hbm [resolvable:$true] %s21_s20  ;;  %s24_s22 = int_to_ptr.vmem [resolvable:$true] %s23_s22 }
   0x2   :  { %s169_s24 = smov 8  }
   0x3   :  { %29 = dma.hbm_to_vmem [thread:$0]  %s22_s20, 2048, %s24_s22, [#allocation3], %s168_s23, %s168_s23, %s169_s24  }
   0x4   :  { %165 = dma.done.wait [#allocation3], 2048  }
   0x5   :  { %166 = vsyncadd [#allocation3], 4294965248  ;;  %v170_v0 = vmov 0   ;;  %v171_v1 = vmov 2   ;;  %v36_v2 = vld [vmem:[%s231_s0] sm:$0xff]  ;;  %v90_v3 = vld [vmem:[#allocation2 + $0x78] sm:$0xff] }
   0x6   :  { %130 = vset.pattern.permute.xlu0 %v170_v0  ;;  %132 = vset.pattern.permute.xlu1 %v171_v1  ;;  %v89_v4 = vld [vmem:[#allocation2 + $0x70] sm:$0xff]  ;;  %v88_v5 = vld [vmem:[#allocation2 + $0x68] sm:$0xff]  ;;  %v87_v6 = vld [vmem:[#allocation2 + $0x60] sm:$0xff]  ;;  %v172_v8 = vmov 1   ;;  %v173_v9 = vmov 3  }
   0x7   :  { %41 = vperm.xlu0 %130, %v36_v2   ;;  %60 = vperm.xlu1 %132, %v36_v2   ;;  %v86_v7 = vld [vmem:[#allocation2 + $0x58] sm:$0xff]  ;;  %v85_v10 = vld [vmem:[#allocation2 + $0x50] sm:$0xff]  ;;  %v84_v11 = vld [vmem:[#allocation2 + $0x48] sm:$0xff] }
   0x8   :  { %91 = vmatpush.msra.mxu0 %v90_v3  ;;  %v83_v12 = vld [vmem:[#allocation2 + $0x40] sm:$0xff]  ;;  %v82_v13 = vld [vmem:[#allocation2 + $0x38] sm:$0xff]  ;;  %v81_v14 = vld [vmem:[#allocation2 + $0x30] sm:$0xff] }
   0x9   :  { %v80_v15 = vld [vmem:[#allocation2 + $0x28] sm:$0xff]  ;;  %v79_v16 = vld [vmem:[#allocation2 + $0x20] sm:$0xff]  ;;  %v78_v17 = vld [vmem:[#allocation2 + $0x18] sm:$0xff] }
   0xa   :  { %92 = vmatpush.msra.mxu0 %v89_v4  ;;  %v77_v18 = vld [vmem:[#allocation2 + $0x10] sm:$0xff]  ;;  %v76_v19 = vld [vmem:[#allocation2 + $0x8] sm:$0xff]  ;;  %v75_v20 = vld [vmem:[#allocation2] sm:$0xff] }
   0xb   :  { %v135_v23 = vld [vmem:[%s232_s1] ss:$0 sm:$0xff]  ;;  %v138_v26 = vld [vmem:[%s232_s1 + $0x1] ss:$0 sm:$0xff]  ;;  %v137_v27 = vld [vmem:[%s232_s1 + $0x2] ss:$0 sm:$0xff] }
   0xc   :  { %93 = vmatpush.msra.mxu0 %v88_v5  ;;  %v136_v24 = vld [vmem:[%s233_s2] ss:$0 sm:$0xff]  ;;  %v139_v28 = vld [vmem:[%s232_s1 + $0x3] ss:$0 sm:$0xff] }
   0xd   :  { %v140_v39 = vld [vmem:[%s235_s4] ss:$0 sm:$0xff] }
   0xe   :  { %94 = vmatpush.msra.mxu0 %v87_v6 }
   0xf   :  { %131 = vset.pattern.permute.xlu0 %v172_v8  ;;  %133 = vset.pattern.permute.xlu1 %v173_v9 }
  0x10   :  { %52 = vperm.xlu0 %131, %v36_v2   ;;  %68 = vperm.xlu1 %133, %v36_v2  }
  0x11   :  { %95 = vmatpush.msra.mxu0 %v86_v7 }
  0x13   :  { %96 = vmatpush.msra.mxu0 %v85_v10 }
  0x15   :  { %97 = vmatpush.msra.mxu0 %v84_v11 }
  0x17   :  { %98 = vmatpush.msra.mxu0 %v83_v12 }
  0x18   :  { %134 = vset.pattern.permute.xlu0 %v173_v9 }
  0x19   :  { %99 = vmatpush.msra.mxu0 %v82_v13 }
  0x1b   :  { %100 = vmatpush.msra.mxu0 %v81_v14 }
  0x1d   :  { %101 = vmatpush.msra.mxu0 %v80_v15 }
  0x1f   :  { %102 = vmatpush.msra.mxu0 %v79_v16 }
  0x21   :  { %103 = vmatpush.msra.mxu0 %v78_v17 }
  0x23   :  { %104 = vmatpush.msra.mxu0 %v77_v18 }
  0x25   :  { %105 = vmatpush.msra.mxu0 %v76_v19 }
  0x27   :  { %106 = vmatpush.msra.mxu0 %v75_v20 }
  0x79   :  { %v42_v21 = vpop.permute.xlu0 %41  ;;  %v61_v22 = vpop.permute.xlu1 %60 }
  0x7a   :  { %v45_v25 = vmul.f32 %v135_v23, %v42_v21  ;;  %v64_v33 = vmul.f32 %v137_v27, %v61_v22 }
  0x7c   :  { %v49_v31 = vadd.f32 %v136_v24, %v45_v25 }
  0x82   :  { %v53_v29 = vpop.permute.xlu0 %52  ;;  %v69_v30 = vpop.permute.xlu1 %68 }
  0x83   :  { %v56_v32 = vmul.f32 %v138_v26, %v53_v29  ;;  %v72_v35 = vmul.f32 %v139_v28, %v69_v30 }
  0x85   :  { %v57_v34 = vadd.f32 %v56_v32, %v49_v31 }
  0x87   :  { %v65_v36 = vadd.f32 %v64_v33, %v57_v34 }
  0x89   :  { %v73_v37 = vadd.f32 %v72_v35, %v65_v36 }
  0x8b   :  { %v74_v38 = vmax.f32 %v73_v37, 0.0 }
  0x8d   :  { %107 = vmatmul.f32.vlgmr.msra.gmra.mxu0 %v74_v38 }
 0x10a   :  { %v108_v40 = vpop.f32.mrf.mxu0 }
 0x10b   :  { %v111_v41 = vadd.f32 %v108_v40, %v74_v38 }
 0x10d   :  { %v116_v42 = vadd.f32 %v140_v39, %v111_v41 }
 0x10f   :  { %117 = vst [vmem:[%s236_s5] sm:$0xff] %v116_v42 }
 0x110   :  { %122 = vsyncpa [#allocation3], 1 }

</bundles_post_ra>
